<compile_context>
chip_gen: v7x
topology: tpu7x:2x2x1
jax: 0.10.0
libtpu: 0.0.40
codegen_flags: <defaults>
</compile_context>

<pallas_src>
import functools

import jax
import jax.numpy as jnp
from jax.experimental import pallas as pl
from jax.experimental.pallas import tpu as pltpu

_LANE = 128
_TARGET_STEP_BYTES = 8 * 1024 * 1024    # ~8 MiB of HBM traffic (3 in + 1 out) per grid step
_MAX_F32_TILE_BYTES = 2 * 1024 * 1024   # bound per-channel f32 intermediates inside the kernel
_VMEM_LIMIT_BYTES = 32 * 1024 * 1024    # == v7x scoped default; safe on v5e/v6e (128 MiB phys)


def _gray_kernel_const(x_ref, o_ref, *, wr, wg, wb):
    # x_ref: VMEM (TB, 3, TR, C) ; o_ref: VMEM (TB, 1, TR, C)
    r = x_ref[:, 0, :, :].astype(jnp.float32)
    g = x_ref[:, 1, :, :].astype(jnp.float32)
    b = x_ref[:, 2, :, :].astype(jnp.float32)
    o_ref[:, 0, :, :] = (wr * r + wg * g + wb * b).astype(o_ref.dtype)


def _gray_kernel_smem(w_ref, x_ref, o_ref):
    # w_ref: SMEM (3,) f32 scalars ; x_ref/o_ref as above.
    r = x_ref[:, 0, :, :].astype(jnp.float32)
    g = x_ref[:, 1, :, :].astype(jnp.float32)
    b = x_ref[:, 2, :, :].astype(jnp.float32)
    o_ref[:, 0, :, :] = (w_ref[0] * r + w_ref[1] * g + w_ref[2] * b).astype(o_ref.dtype)


def _choose_tiling(B, rows, cols, itemsize):
    """Pick (TB, TR, nb, nt): ~8 MiB HBM traffic per step, double-buffered block
    footprint well under every generation's scoped VMEM, and >= 2 grid steps
    whenever possible (v7x has 2 TensorCores)."""
    r_cap = min(_TARGET_STEP_BYTES // (4 * cols * itemsize),
                _MAX_F32_TILE_BYTES // (cols * 4))
    r_cap = max(8, (r_cap // 8) * 8)

    if rows > r_cap:
        tr, tb = r_cap, 1                       # large images: tile spatially
    else:
        tr = rows                               # small images: fold the batch axis
        tb = max(1, r_cap // rows)
        tb = min(tb, B)
        if B >= 2:
            tb = min(tb, pl.cdiv(B, 2))         # keep >= 2 parallel grid steps

    nb, nt = pl.cdiv(B, tb), pl.cdiv(rows, tr)
    if nb == 1 and nt == 1 and rows >= 16:
        # Single small image: still split spatially so DMA/compute overlap and
        # both v7x TensorCores get work.
        tr = max(8, (rows // 4) // 8 * 8)
        nt = pl.cdiv(rows, tr)
    return tb, tr, nb, nt


def rgb_to_grayscale(image: jax.Array, rgb_weights: jax.Array | None = None) -> jax.Array:
    """Pallas TPU equivalent of the reference `rgb_to_grayscale`."""
    image = jnp.asarray(image)
    if image.ndim < 3 or image.shape[-3] != 3:
        raise ValueError(f"Input size must have a shape of [*, 3, H, W]. Got: {image.shape}")
    if not jnp.issubdtype(image.dtype, jnp.floating):
        # TODO(synk): integer-dtype images (torch allows them when weight dtype matches).
        raise TypeError(f"Expected a floating point image in [0, 1]. Got dtype: {image.dtype}")

    lead = image.shape[:-3]
    H, W = image.shape[-2], image.shape[-1]
    P = H * W
    B = 1
    for d in lead:
        B *= int(d)

    # Lane-dense (rows, 128) view when H*W is a multiple of 128; otherwise keep
    # (H, W) as-is (no padded copies, last lane group is simply masked).
    if P % _LANE == 0:
        rows, cols = P // _LANE, _LANE
    else:
        rows, cols = H, W
    x = image.reshape((B, 3, rows, cols))        # contiguous metadata reshape

    itemsize = jnp.dtype(image.dtype).itemsize
    TB, TR, nb, nt = _choose_tiling(B, rows, cols, itemsize)

    x_spec = pl.BlockSpec((TB, 3, TR, cols), lambda b, t: (b, 0, t, 0))
    o_spec = pl.BlockSpec((TB, 1, TR, cols), lambda b, t: (b, 0, t, 0))

    if rgb_weights is None:
        # Default weights baked as compile-time constants: no SMEM operand at all.
        kernel = functools.partial(_gray_kernel_const, wr=0.299, wg=0.587, wb=0.114)
        in_specs = [x_spec]
        operands = (x,)
    else:
        w = jnp.asarray(rgb_weights)
        if w.shape[-1] != 3:
            raise ValueError(f"rgb_weights must have a shape of [*, 3]. Got: {w.shape}")
        if w.ndim != 1:
            # TODO(synk): batched / per-image rgb_weights are not supported; the torch
            # reference (unbind along dim 0) also only truly supports 1-D weights.
            raise NotImplementedError(f"Only rgb_weights of shape (3,) are supported. Got: {w.shape}")
        kernel = _gray_kernel_smem
        in_specs = [pl.BlockSpec(memory_space=pltpu.SMEM), x_spec]
        operands = (w.astype(jnp.float32), x)

    cost = pl.CostEstimate(
        flops=5 * B * P,                         # 3 mul + 2 add per output pixel
        transcendentals=0,
        bytes_accessed=4 * B * P * itemsize,     # 3 channels read + 1 written
    )

    out = pl.pallas_call(
        kernel,
        out_shape=jax.ShapeDtypeStruct((B, 1, rows, cols), image.dtype),
        grid=(nb, nt),
        in_specs=in_specs,
        out_specs=o_spec,
        compiler_params=pltpu.CompilerParams(
            dimension_semantics=("parallel", "parallel"),
            vmem_limit_bytes=_VMEM_LIMIT_BYTES,
        ),
        cost_estimate=cost,
    )(*operands)

    return out.reshape(lead + (1, H, W))


class RgbToGrayscale:
    """Module-style wrapper mirroring the PyTorch class."""

    def __init__(self, rgb_weights: jax.Array | None = None):
        self.rgb_weights = rgb_weights

    def __call__(self, image: jax.Array) -> jax.Array:
        return rgb_to_grayscale(image, rgb_weights=self.rgb_weights)


if __name__ == "__main__":
    key = jax.random.PRNGKey(0)
    k0, k1, k2 = jax.random.split(key, 3)

    def _ref(img, w=(0.299, 0.587, 0.114)):
        w = jnp.asarray(w, jnp.float32)
        return (w[0] * img[..., 0:1, :, :]
                + w[1] * img[..., 1:2, :, :]
                + w[2] * img[..., 2:3, :, :]).astype(img.dtype)

    # 1) Lane-dense path (H*W % 128 == 0), default (baked-constant) weights.
    x1 = jax.random.uniform(k0, (2, 3, 16, 16), dtype=jnp.float32)
    g1 = jax.block_until_ready(rgb_to_grayscale(x1))
    assert g1.shape == (2, 1, 16, 16)
    assert jnp.allclose(g1, _ref(x1), atol=1e-6, rtol=1e-6)

    # 2) Ragged path (H*W % 128 != 0, no padded copies), user weights via SMEM.
    x2 = jax.random.uniform(k1, (2, 3, 4, 5), dtype=jnp.float32)
    w2 = jnp.array([0.2126, 0.7152, 0.0722], dtype=jnp.float32)
    g2 = jax.block_until_ready(rgb_to_grayscale(x2, w2))
    assert g2.shape == (2, 1, 4, 5)
    assert jnp.allclose(g2, _ref(x2, w2), atol=1e-6, rtol=1e-6)

    # 3) Batch-folded path (TB > 1, ragged final batch tile), module wrapper.
    x3 = jax.random.uniform(k2, (5, 3, 16, 16), dtype=jnp.float32)
    g3 = jax.block_until_ready(RgbToGrayscale()(x3))
    assert g3.shape == (5, 1, 16, 16)
    assert jnp.allclose(g3, _ref(x3), atol=1e-6, rtol=1e-6)

    print("KERNEL_OK")
</pallas_src>

<mosaic_0001>
module attributes {stable_mosaic.version = 11 : i64} {
  func.func @_gray_kernel_const(%arg0: i32, %arg1: i32, %arg2: memref<1x3x2x128xf32, #tpu.memory_space<vmem>>, %arg3: memref<1x1x2x128xf32, #tpu.memory_space<vmem>>) attributes {dimension_semantics = [#tpu.dimension_semantics<parallel>, #tpu.dimension_semantics<parallel>], iteration_bounds = array<i64: 2, 1>, scalar_prefetch = 0 : i64, scratch_operands = 0 : i64, tpu.core_type = #tpu.core_type<tc>, window_params = [{transform_indices = @transform_0, window_bounds = array<i64: 1, 3, 2, 128>}, {transform_indices = @transform_1, window_bounds = array<i64: 1, 1, 2, 128>}]} {
    %c0 = arith.constant 0 : index
    %c0_0 = arith.constant 0 : index
    %c0_1 = arith.constant 0 : index
    %c0_2 = arith.constant 0 : index
    %0 = vector.load %arg2[%c0, %c0_0, %c0_1, %c0_2] : memref<1x3x2x128xf32, #tpu.memory_space<vmem>>, vector<1x1x2x128xf32>
    %1 = vector.shape_cast %0 : vector<1x1x2x128xf32> to vector<1x2x128xf32>
    %c0_3 = arith.constant 0 : index
    %c1 = arith.constant 1 : index
    %c0_4 = arith.constant 0 : index
    %c0_5 = arith.constant 0 : index
    %2 = vector.load %arg2[%c0_3, %c1, %c0_4, %c0_5] : memref<1x3x2x128xf32, #tpu.memory_space<vmem>>, vector<1x1x2x128xf32>
    %3 = vector.shape_cast %2 : vector<1x1x2x128xf32> to vector<1x2x128xf32>
    %c0_6 = arith.constant 0 : index
    %c2 = arith.constant 2 : index
    %c0_7 = arith.constant 0 : index
    %c0_8 = arith.constant 0 : index
    %4 = vector.load %arg2[%c0_6, %c2, %c0_7, %c0_8] : memref<1x3x2x128xf32, #tpu.memory_space<vmem>>, vector<1x1x2x128xf32>
    %5 = vector.shape_cast %4 : vector<1x1x2x128xf32> to vector<1x2x128xf32>
    %cst = arith.constant 2.990000e-01 : f32
    %6 = vector.broadcast %cst : f32 to vector<1x2x128xf32>
    %7 = arith.mulf %6, %1 : vector<1x2x128xf32>
    %cst_9 = arith.constant 5.870000e-01 : f32
    %8 = vector.broadcast %cst_9 : f32 to vector<1x2x128xf32>
    %9 = arith.mulf %8, %3 : vector<1x2x128xf32>
    %10 = arith.addf %7, %9 : vector<1x2x128xf32>
    %cst_10 = arith.constant 1.140000e-01 : f32
    %11 = vector.broadcast %cst_10 : f32 to vector<1x2x128xf32>
    %12 = arith.mulf %11, %5 : vector<1x2x128xf32>
    %13 = arith.addf %10, %12 : vector<1x2x128xf32>
    %c0_11 = arith.constant 0 : index
    %c0_12 = arith.constant 0 : index
    %c0_13 = arith.constant 0 : index
    %c0_14 = arith.constant 0 : index
    %14 = vector.load %arg3[%c0_11, %c0_12, %c0_13, %c0_14] : memref<1x1x2x128xf32, #tpu.memory_space<vmem>>, vector<1x1x2x128xf32>
    %15 = vector.shape_cast %14 : vector<1x1x2x128xf32> to vector<1x2x128xf32>
    %16 = vector.shape_cast %13 : vector<1x2x128xf32> to vector<1x1x2x128xf32>
    tpu.vector_store %arg3[%c0_11, %c0_12, %c0_13, %c0_14], %16 {strides = array<i32>} : memref<1x1x2x128xf32, #tpu.memory_space<vmem>>, vector<1x1x2x128xf32>,
    return
  }
  func.func @transform_0(%arg0: i32, %arg1: i32) -> (i32, i32, i32, i32) {
    %c0_i32 = arith.constant 0 : i32
    %c0_i32_0 = arith.constant 0 : i32
    %c0_i32_1 = arith.constant 0 : i32
    return %arg0, %c0_i32, %arg1, %c0_i32_0 : i32, i32, i32, i32
  }
  func.func @transform_1(%arg0: i32, %arg1: i32) -> (i32, i32, i32, i32) {
    %c0_i32 = arith.constant 0 : i32
    %c0_i32_0 = arith.constant 0 : i32
    %c0_i32_1 = arith.constant 0 : i32
    return %arg0, %c0_i32, %arg1, %c0_i32_0 : i32, i32, i32, i32
  }
}

</mosaic_0001>

<bundles_post_ra>
// kernel: tpu_custom_call.1
= control target key start
LH: loop header
LB: loop body
LE: loop exit
PB: predicated region body
PF: predicated region fallthrough
CT: control target
= control target key end

     0   :  { %6 = vsyncpa [#allocation3], 0  ;;  %s641_s0 = inlined_call_operand.hbm [shape: f32[2,3,2,128], index: 0, kind: input, shape index: {}]   ;;  %s642_s1 = inlined_call_operand.hbm [shape: f32[2,1,2,128], index: 1, kind: output, shape index: {}]  }
   0x1   :  { %8 = vsyncpa [#allocation3 + $0x1], 0 }
   0x2   :  { %9 = vsyncpa [#allocation4], 0 }
   0x3   :  { %11 = vsyncpa [#allocation4 + $0x1], 0  ;;  %s467_s6 = smov 0   ;;  %s469_s7 = smov 0  }
   0x4   :  { %s471_s8 = smov 0   ;;  %s473_s9 = smov 0  }
   0x5   :  { %s475_s10 = smov 0   ;;  %s477_s11 = smov 0  }
   0x6 LB: > { %s259_s12 = sadd.s32 4294967295, %s451_s11   ;;  %s260_s13 = sadd.s32 4294967294, %s451_s11   ;;  %s451_s11 = sphi %s477_s11, %s17_s11   ;;  %s447_s10 = sphi %s475_s10, %s657_s10   ;;  %s443_s9 = sphi %s473_s9, %s656_s9   ;;  %s439_s8 = sphi %s471_s8, %s655_s8   ;;  %s435_s7 = sphi %s469_s7, %s654_s7   ;;  %s431_s6 = sphi %s467_s6, %s653_s6  }
   0x7   : > { %s29_s14 = sadd.s32 1, %s447_s10  ;;  %s38_s15 = sadd.s32 1, %s439_s8 }
   0x8   : > { %p31_p0 = scmp.ge.s32.totalorder %s29_s14, 2  ;;  %p45_p1 = scmp.ne.s32.totalorder %s439_s8, %s435_s7 }
   0x9   : > { %p46_p2 = scmp.eq.s32.totalorder %s451_s11, 0  ;;  %p51_p3 = scmp.ne.s32.totalorder %s435_s7, %s431_s6 }
   0xa   : > { %s659_s14 = smov (%p31_p0, %s29_s14), 0  ;;  %p52_p5 = scmp.eq.s32.totalorder %s259_s12, 0 }
   0xb   : > { %p508_p4 = por %p46_p2, %p45_p1  ;;  %s33_s17 = ssub.s32 %s447_s10, %s659_s14 }
   0xc   : > { %p77_p6 = scmp.eq.s32.totalorder %s259_s12, 1  ;;  %p36_p7 = scmp.eq.s32.totalorder %s33_s17, 0 }
   0xd   : > { %p514_p8 = por %p52_p5, %p51_p3  ;;  %p83_p10 = scmp.eq.s32.totalorder %s260_s13, 1 }
   0xe   : > { %p518_p9 = por %p77_p6, %p45_p1  ;;  %p287_p13 = scmp.lt.s32.totalorder %s451_s11, 2 }
   0xf   : > { %s523_s20 = scalar_select %p36_p7, %s439_s8, %s38_s15  }
  0x10   : > { %s646_s19 = scalar_select %p518_p9, 1, 0 }
  0x11   : > { %p525_p11 = por %p83_p10, %p51_p3  ;;  %s103_s22 = sand.u32 1, %s439_s8  }
  0x12   : > { %s272_s23 = smul.u32 6, %s103_s22  ;;  %p535_p0 = pnand %p287_p13, %p508_p4 }
  0x13   : > { %s647_s21 = scalar_select %p525_p11, 1, 0 }
  0x14   : > { %s273_s24 = smul.u32 96, %s447_s10  ;;  %s107_s29 = scalar_lea.vmem [#allocation2], %s272_s23 }
  0x15   : > { %s115_s30 = sshll.u32 %s107_s29, 4  ;;  %s547_s2 = scalar_lea.sflag [#allocation3], %s103_s22  ;;  %s544_s30 = int_to_ptr.vmem [resolvable:$true] %s115_s30 }
  0x16   : > { %s542_s28 = scalar_lea.hbm %s641_s0, %s273_s24  ;;  %p341_p3 = pneg %p535_p0 }
  0x17   : > { %s339_s3 = scalar_lea.hbm %s542_s28, 96  ;;  %s344_s12 = scalar_lea.hbm %s641_s0, 192 }
  0x18   : > { %p340_p2 = scmp.ne.s32.totalorder %s542_s28, %s339_s3  ;;  %p345_p6 = scmp.lt.u32.totalorder %s542_s28, %s641_s0 }
  0x19   : > { %p346_p7 = scmp.lt.u32.totalorder %s344_s12, %s339_s3  ;;  %p348_p13 = scmp.lt.u32.totalorder %s339_s3, %s542_s28 }
  0x1a   : > { %p342_p4 = pnand %p341_p3, %p340_p2 }
  0x1b   : > { %p347_p10 = por %p346_p7, %p345_p6 }
  0x1c   : > { %p343_p5 = pneg %p342_p4 }
  0x1d   : > { %p349_p12 = por %p348_p13, %p347_p10 }
  0x1f   : > { %p350_p1 = pnand %p349_p12, %p343_p5 }
  0x21   : > { %353 = shalt.err (!%p350_p1)
}
  0x22   : > { %s354_s16 = scalar_lea.vmem %s544_s30, 96  ;;  %s453_s17 = smov [#allocation2]  }
  0x23   : > { %p355_p2 = scmp.ne.s32.totalorder %s544_s30, %s354_s16  ;;  %s359_s22 = sshll.u32 %s453_s17, 4  ;;  %s360_s22 = int_to_ptr.vmem [resolvable:$false] %s359_s22 }
  0x24   : > { %s361_s23 = scalar_lea.vmem %s360_s22, 192  ;;  %p362_p9 = scmp.lt.s32.totalorder %s544_s30, %s360_s22 }
  0x25   : > { %p357_p4 = pnand %p355_p2, %p341_p3  ;;  %p363_p6 = scmp.lt.s32.totalorder %s361_s23, %s354_s16 }
  0x27   : > { %p358_p11 = pneg %p357_p4  ;;  %p364_p7 = por %p363_p6, %p362_p9 }
  0x29   : > { %p365_p10 = pnand %p364_p7, %p358_p11 }
  0x2b   : > { %368 = shalt.err (!%p365_p10)
}
  0x2c   : > { %s454_s24 = smov 32   ;;  %s455_s26 = smov 2  }
  0x2d   : > { %282 = dma.hbm_to_vmem [thread:$0]  (!%p535_p0), %s542_s28, 96, %s544_s30, %s547_s2, %s454_s24, %s454_s24, %s455_s26  }
  0x2e   : > { %p123_p12 = scmp.lt.s32.totalorder %s451_s11, 3  ;;  %p649_p1 = scmp.ge.s32.totalorder %s451_s11, 1 }
  0x30   : > { %p124_p3 = pnand %p649_p1, %p123_p12 }
  0x31   : > { %s579_s27 = sand.u32 (!%p124_p3), 1, %s435_s7  }
  0x32   : > { %127 = sbr.rel (%p124_p3) target bundleno = 86 (0x56), region = 24  ;;  %s130_s3 = scalar_lea.sflag (!%p124_p3), [#allocation3], %s579_s27 }
  0x33   : > { %s274_s29 = smul.u32 (!%p124_p3), 6, %s579_s27 }
  0x35   : > { %s133_s4 = scalar_lea.vmem (!%p124_p3), [#allocation2], %s274_s29 }
  0x39   : > { %422 = dma.done.wait (%p514_p8), %s130_s3, 96  }
  0x3a   : > { %424 = vsyncadd (%p514_p8), %s130_s3, 4294967200  ;;  %s265_s25 = sshll.u32 %s579_s27, 1  ;;  %v152_v0 = vld [vmem:[%s133_s4] sm:$0x3]  ;;  %v266_v1 = vld [vmem:[%s133_s4 + $0x2] sm:$0x3] }
  0x3b   : > { %v267_v2 = vld [vmem:[%s133_s4 + $0x4] sm:$0x3]  ;;  %v157_v3 = vmul.f32 0.299, %v152_v0  ;;  %v158_v4 = vmul.f32 0.587, %v266_v1 }
  0x3c   : > { %v160_v5 = vmul.f32 0.114, %v267_v2  ;;  %s151_s28 = scalar_lea.vmem [#allocation5], %s265_s25  ;;  %s269_s2 = sshll.u32 %s443_s9, 5 }
  0x3d   : > { %s178_s30 = sshll.u32 %s151_s28, 4  ;;  %v159_v6 = vadd.f32 %v158_v4, %v157_v3  ;;  %s594_s12 = scalar_lea.hbm %s642_s1, %s269_s2  ;;  %s589_s30 = int_to_ptr.vmem [resolvable:$true] %s178_s30 }
  0x3e   : > { %s164_s13 = scalar_lea.sflag [#allocation4], %s579_s27  ;;  %s369_s15 = scalar_lea.vmem %s589_s30, 32 }
  0x3f   : > { %v161_v7 = vadd.f32 %v160_v5, %v159_v6  ;;  %p370_p8 = scmp.ne.s32.totalorder %s589_s30, %s369_s15  ;;  %p650_p9 = scmp.ne.s32.totalorder %s646_s19, 0 }
  0x40   : > { %s456_s9 = smov [#allocation5]  }
  0x41   : > { %162 = vst [vmem:[%s151_s28] sm:$0x3] %v161_v7  ;;  %p371_p11 = pnand %p370_p8, %p650_p9  ;;  %s373_s16 = sshll.u32 %s456_s9, 4  ;;  %s374_s16 = int_to_ptr.vmem [resolvable:$false] %s373_s16 }
  0x42   : > { %s375_s17 = scalar_lea.vmem %s374_s16, 64  ;;  %p376_p5 = scmp.lt.s32.totalorder %s589_s30, %s374_s16 }
  0x43   : > { %p372_p0 = pneg %p371_p11  ;;  %p377_p13 = scmp.lt.s32.totalorder %s375_s17, %s369_s15 }
  0x45   : > { %p378_p2 = por %p377_p13, %p376_p5 }
  0x47   : > { %p379_p4 = pnand %p378_p2, %p372_p0 }
  0x49   : > { %382 = shalt.err (!%p379_p4)
}
  0x4a   : > { %s383_s22 = scalar_lea.hbm %s594_s12, 32  ;;  %s387_s26 = scalar_lea.hbm %s642_s1, 64 }
  0x4b   : > { %p384_p6 = scmp.ne.s32.totalorder %s594_s12, %s383_s22  ;;  %p388_p12 = scmp.lt.u32.totalorder %s594_s12, %s642_s1 }
  0x4c   : > { %p389_p1 = scmp.lt.u32.totalorder %s387_s26, %s383_s22  ;;  %p391_p8 = scmp.lt.u32.totalorder %s383_s22, %s594_s12 }
  0x4d   : > { %p385_p7 = pnand %p384_p6, %p650_p9 }
  0x4e   : > { %p390_p3 = por %p389_p1, %p388_p12 }
  0x4f   : > { %p386_p10 = pneg %p385_p7 }
  0x50   : > { %p392_p11 = por %p391_p8, %p390_p3 }
  0x52   : > { %p393_p0 = pnand %p392_p11, %p386_p10 }
  0x54   : > { %396 = shalt.err (!%p393_p0)
}
  0x55   : > { %277 = dma.vmem_to_hbm [thread:$0]  (%p650_p9), %s589_s30, 32, %s594_s12, %s164_s13  }
  0x56 PF: > { %s190_s3 = sand.u32 1, %s431_s6   ;;  %p651_p5 = scmp.ne.s32.totalorder %s647_s21, 0 }
  0x57   : > { %p652_p13 = scmp.ge.s32.totalorder %s451_s11, 2  ;;  %s191_s4 = scalar_lea.sflag [#allocation4], %s190_s3 }
  0x59   : > { %p284_p2 = pnand %p652_p13, %p651_p5 }
  0x5b   : > { %426 = dma.done.wait (!%p284_p2), %s191_s4, 32  }
  0x5c   : > { %428 = vsyncadd (!%p284_p2), %s191_s4, 4294967264  ;;  %s17_s11 = sadd.s32 1, %s451_s11   ;;  %s653_s6 = smov %s435_s7 }
  0x5d   : > { %p14_p4 = scmp.ge.s32.totalorder %s17_s11, 4   ;;  %s654_s7 = smov %s439_s8 }
  0x5e   : > { %s655_s8 = smov %s523_s20  ;;  %s656_s9 = smov %s447_s10 }
  0x5f   : > { %s657_s10 = smov %s659_s14  ;;  %16 = sbr.rel (!%p14_p4) target bundleno = 6 (0x6), region = 71 }
  0x66   :  { %196 = vsyncpa [#allocation3], 1 }
  0x67   :  { %198 = vsyncpa [#allocation3 + $0x1], 1 }
  0x68   :  { %199 = vsyncpa [#allocation4], 1 }
  0x69   :  { %201 = vsyncpa [#allocation4 + $0x1], 1 }

</bundles_post_ra>
